<compile_context>
chip_gen: v7x
topology: tpu7x:2x2x1
jax: 0.10.0
libtpu: 0.0.40
codegen_flags: <defaults>
</compile_context>

<pallas_src>
import functools
import math

import jax
import jax.numpy as jnp
from jax.experimental import pallas as pl
from jax.experimental.pallas import tpu as pltpu


def _round_up(v, m):
    return ((v + m - 1) // m) * m


# ----------------------------- kernel bodies ------------------------------
# Max-form: leaky_relu(x)*s == max(x*s, x*(slope*s)) for 0<=slope<=1, s>=0.
def _kernel_bias_max(x_ref, b_ref, o_ref, *, negative_slope, scale):
    xb = x_ref[...] + b_ref[...]          # bias broadcasts over lanes or rows
    o_ref[...] = jnp.maximum(xb * scale, xb * (negative_slope * scale)).astype(o_ref.dtype)


def _kernel_bias_where(x_ref, b_ref, o_ref, *, negative_slope, scale):
    xb = x_ref[...] + b_ref[...]
    o_ref[...] = (jnp.where(xb >= 0, xb, xb * negative_slope) * scale).astype(o_ref.dtype)


def _kernel_nobias_max(x_ref, o_ref, *, negative_slope, scale):
    x = x_ref[...]
    o_ref[...] = jnp.maximum(x * scale, x * (negative_slope * scale)).astype(o_ref.dtype)


def _kernel_nobias_where(x_ref, o_ref, *, negative_slope, scale):
    x = x_ref[...]
    o_ref[...] = (jnp.where(x >= 0, x, x * negative_slope) * scale).astype(o_ref.dtype)


# ------------------------------- tiling -----------------------------------
def _pick_tiles(rows, cols, itemsize, sub):
    """Large lane-dense tiles (~4 MiB VMEM per buffer); >=2 grid programs
    whenever the slab is splittable (feeds both v7x TensorCores)."""
    tile_budget = 4 * 1024 * 1024

    lane_cap = 2048  # multiple of 128
    if rows < sub:
        # Few rows (e.g. (N, C*H*W) fold with tiny N): widen tiles instead so
        # each grid step still moves a meaningful slab. Account for sublane
        # padding (a block's rows are padded to `sub` in VMEM).
        lane_cap = max(lane_cap, (tile_budget // (sub * itemsize)) // 128 * 128)
    tc = cols if cols <= lane_cap else lane_cap

    # Row tile: biggest multiple of `sub` keeping the (lane-padded) block
    # inside the budget.
    tc_pad = _round_up(tc, 128)
    tr_cap = max(sub, (tile_budget // (tc_pad * itemsize)) // sub * sub)
    tr = rows if rows <= tr_cap else tr_cap

    # Ensure >= 2 grid programs when possible (v7x megacore sharding).
    if pl.cdiv(rows, tr) * pl.cdiv(cols, tc) == 1:
        if rows >= 2 * sub:
            tr = _round_up(pl.cdiv(rows, 2), sub)
        elif cols >= 256:
            tc = _round_up(pl.cdiv(cols, 2), 128)
    return tr, tc


# ------------------------------- wrapper -----------------------------------
def fused_leaky_relu(x, bias=None, negative_slope=0.2, scale=math.sqrt(2.0)):
    """x: (N, C, *spatial) array (ndim >= 2); bias: (C,) or None."""
    if x.ndim < 2:
        raise ValueError("fused_leaky_relu expects input with ndim >= 2")
    n, c = x.shape[0], x.shape[1]
    spatial = 1
    for d in x.shape[2:]:
        spatial *= d

    dtype = x.dtype
    itemsize = jnp.dtype(dtype).itemsize
    sub = max(8, 32 // itemsize)  # f32 -> 8, bf16 -> 16, int8 -> 32

    # Fold to a 2-D slab, keeping the lane (last) dim dense.
    if spatial >= 128:
        rows, cols = n * c, spatial      # one bias value per row
        bias_mode = "col"
    else:
        rows, cols = n, c * spatial      # one bias vector per lane position
        bias_mode = "row"
    x2d = x.reshape(rows, cols)

    tr, tc = _pick_tiles(rows, cols, itemsize, sub)
    grid = (pl.cdiv(rows, tr), pl.cdiv(cols, tc))

    has_bias = bias is not None
    operands = [x2d]
    in_specs = [pl.BlockSpec((tr, tc), lambda i, j: (i, j))]
    bias_bytes = 0
    if has_bias:
        b = bias.astype(dtype)
        if bias_mode == "col":
            # Row r of the (N*C, H*W) slab is channel r % C (host-side glue).
            b_op = jnp.tile(b, (n,)).reshape(rows, 1)
            # Depends only on the row axis: with the column axis innermost the
            # bias block stays resident across column tiles.
            in_specs.append(pl.BlockSpec((tr, 1), lambda i, j: (i, 0)))
            bias_bytes = rows * itemsize
        else:
            b_op = jnp.repeat(b, spatial).reshape(1, cols)
            in_specs.append(pl.BlockSpec((1, tc), lambda i, j: (0, j)))
            bias_bytes = cols * itemsize
        operands.append(b_op)

    max_form = (0.0 <= negative_slope <= 1.0) and scale >= 0.0
    if has_bias:
        body = _kernel_bias_max if max_form else _kernel_bias_where
    else:
        body = _kernel_nobias_max if max_form else _kernel_nobias_where
    kernel = functools.partial(body, negative_slope=negative_slope, scale=scale)

    out2d = pl.pallas_call(
        kernel,
        out_shape=jax.ShapeDtypeStruct((rows, cols), dtype),
        grid=grid,
        in_specs=in_specs,
        out_specs=pl.BlockSpec((tr, tc), lambda i, j: (i, j)),
        compiler_params=pltpu.CompilerParams(
            dimension_semantics=("parallel", "parallel"),
            vmem_limit_bytes=32 * 1024 * 1024,
        ),
        cost_estimate=pl.CostEstimate(
            flops=4 * rows * cols,
            transcendentals=0,
            bytes_accessed=2 * rows * cols * itemsize + bias_bytes,
        ),
    )(*operands)

    return out2d.reshape(x.shape)


class FusedLeakyReLU:
    """JAX/Pallas port of the PyTorch FusedLeakyReLU module."""

    def __init__(self, channel, bias=True, negative_slope=0.2, scale=math.sqrt(2.0)):
        # nn.Parameter(torch.zeros(channel)) -> deterministic zeros init.
        self.bias = jnp.zeros((channel,), dtype=jnp.float32) if bias else None
        self.negative_slope = negative_slope
        self.scale = scale

    def __call__(self, x):
        return fused_leaky_relu(x, self.bias, self.negative_slope, self.scale)


def _reference(x, bias, negative_slope, scale):
    if bias is not None:
        shape = (1, bias.shape[0]) + (1,) * (x.ndim - 2)
        x = x + bias.reshape(shape).astype(x.dtype)
    return jnp.where(x >= 0, x, x * negative_slope) * scale


if __name__ == "__main__":
    key = jax.random.PRNGKey(0)
    k1, k2, k3 = jax.random.split(key, 3)

    # Case 1: lane-friendly spatial size -> (N*C, H*W) fold, bias column.
    N, C, H, W = 2, 4, 16, 16
    x = jax.random.normal(k1, (N, C, H, W), dtype=jnp.float32)
    mod = FusedLeakyReLU(channel=C, bias=True)
    mod.bias = jax.random.normal(k2, (C,), dtype=jnp.float32)  # non-trivial bias
    out = mod(x)
    jax.block_until_ready(out)
    ref = _reference(x, mod.bias, mod.negative_slope, mod.scale)
    assert out.shape == (N, C, H, W)
    assert jnp.allclose(out, ref, atol=1e-5, rtol=1e-5), "case 1 mismatch"

    # Case 2: small spatial size -> lane-dense (N, C*H*W) fold, bias row.
    x_small = jax.random.normal(k3, (2, 4, 5, 5), dtype=jnp.float32)
    out_small = mod(x_small)
    jax.block_until_ready(out_small)
    ref_small = _reference(x_small, mod.bias, mod.negative_slope, mod.scale)
    assert jnp.allclose(out_small, ref_small, atol=1e-5, rtol=1e-5), "case 2 mismatch"

    # Case 3: bias disabled -> single-input kernel (no bias DMA / add).
    mod_nb = FusedLeakyReLU(channel=C, bias=False)
    out_nb = mod_nb(x)
    jax.block_until_ready(out_nb)
    ref_nb = _reference(x, None, mod_nb.negative_slope, mod_nb.scale)
    assert jnp.allclose(out_nb, ref_nb, atol=1e-5, rtol=1e-5), "case 3 mismatch"

    print("KERNEL_OK")
</pallas_src>

<mosaic_0001>
module attributes {stable_mosaic.version = 11 : i64} {
  func.func @_kernel_bias_max(%arg0: i32, %arg1: i32, %arg2: memref<8x128xf32, #tpu.memory_space<vmem>>, %arg3: memref<8x1xf32, #tpu.memory_space<vmem>>, %arg4: memref<8x128xf32, #tpu.memory_space<vmem>>) attributes {dimension_semantics = [#tpu.dimension_semantics<parallel>, #tpu.dimension_semantics<parallel>], iteration_bounds = array<i64: 1, 2>, scalar_prefetch = 0 : i64, scratch_operands = 0 : i64, tpu.core_type = #tpu.core_type<tc>, window_params = [{transform_indices = @transform_0, window_bounds = array<i64: 8, 128>}, {transform_indices = @transform_1, window_bounds = array<i64: 8, 1>}, {transform_indices = @transform_2, window_bounds = array<i64: 8, 128>}]} {
    %c0 = arith.constant 0 : index
    %c0_0 = arith.constant 0 : index
    %0 = vector.load %arg2[%c0, %c0_0] : memref<8x128xf32, #tpu.memory_space<vmem>>, vector<8x128xf32>
    %c0_1 = arith.constant 0 : index
    %c0_2 = arith.constant 0 : index
    %1 = vector.load %arg3[%c0_1, %c0_2] : memref<8x1xf32, #tpu.memory_space<vmem>>, vector<8x1xf32>
    %2 = vector.broadcast %1 : vector<8x1xf32> to vector<8x128xf32>
    %3 = arith.addf %0, %2 : vector<8x128xf32>
    %cst = arith.constant 1.41421354 : f32
    %4 = vector.broadcast %cst : f32 to vector<8x128xf32>
    %5 = arith.mulf %3, %4 : vector<8x128xf32>
    %cst_3 = arith.constant 0.282842726 : f32
    %6 = vector.broadcast %cst_3 : f32 to vector<8x128xf32>
    %7 = arith.mulf %3, %6 : vector<8x128xf32>
    %8 = arith.maximumf %5, %7 : vector<8x128xf32>
    %c0_4 = arith.constant 0 : index
    %c0_5 = arith.constant 0 : index
    %9 = vector.load %arg4[%c0_4, %c0_5] : memref<8x128xf32, #tpu.memory_space<vmem>>, vector<8x128xf32>
    tpu.vector_store %arg4[%c0_4, %c0_5], %8 {strides = array<i32>} : memref<8x128xf32, #tpu.memory_space<vmem>>, vector<8x128xf32>,
    return
  }
  func.func @transform_0(%arg0: i32, %arg1: i32) -> (i32, i32) {
    %c0_i32 = arith.constant 0 : i32
    return %arg0, %arg1 : i32, i32
  }
  func.func @transform_1(%arg0: i32, %arg1: i32) -> (i32, i32) {
    %c0_i32 = arith.constant 0 : i32
    %c0_i32_0 = arith.constant 0 : i32
    return %arg0, %c0_i32 : i32, i32
  }
  func.func @transform_2(%arg0: i32, %arg1: i32) -> (i32, i32) {
    %c0_i32 = arith.constant 0 : i32
    return %arg0, %arg1 : i32, i32
  }
}

</mosaic_0001>

<bundles_post_ra>
// kernel: tpu_custom_call.1
= control target key start
LH: loop header
LB: loop body
LE: loop exit
PB: predicated region body
PF: predicated region fallthrough
CT: control target
= control target key end

     0   :  { %7 = vsyncpa [#allocation3], 0  ;;  %s704_s0 = inlined_call_operand.hbm [shape: f32[8,256], index: 0, kind: input, shape index: {}]   ;;  %s705_s1 = inlined_call_operand.vmem [shape: f32[8,1], index: 1, kind: input, shape index: {}]   ;;  %s706_s2 = inlined_call_operand.hbm [shape: f32[8,256], index: 2, kind: output, shape index: {}]  }
   0x1   :  { %9 = vsyncpa [#allocation3 + $0x1], 0 }
   0x2   :  { %10 = vsyncpa [#allocation4], 0 }
   0x3   :  { %12 = vsyncpa [#allocation4 + $0x1], 0  ;;  %s529_s9 = smov 0   ;;  %s531_s10 = smov 0  }
   0x4   :  { %s533_s11 = smov 0   ;;  %s535_s12 = smov 0  }
   0x5   :  { %s537_s13 = smov 0   ;;  %s539_s14 = smov 0  }
   0x6 LB: > { %s319_s15 = sadd.s32 4294967295, %s509_s14   ;;  %s320_s16 = sadd.s32 4294967294, %s509_s14   ;;  %s509_s14 = sphi %s539_s14, %s18_s14   ;;  %s505_s13 = sphi %s537_s13, %s722_s13   ;;  %s501_s12 = sphi %s535_s12, %s721_s12   ;;  %s497_s11 = sphi %s533_s11, %s720_s11   ;;  %s493_s10 = sphi %s531_s10, %s719_s10   ;;  %s489_s9 = sphi %s529_s9, %s718_s9  }
   0x7   : > { %s27_s17 = sadd.s32 1, %s505_s13  ;;  %s39_s18 = sadd.s32 1, %s497_s11 }
   0x8   : > { %p28_p0 = scmp.ge.s32.totalorder %s27_s17, 2  ;;  %p46_p1 = scmp.ne.s32.totalorder %s497_s11, %s493_s10 }
   0x9   : > { %p47_p2 = scmp.eq.s32.totalorder %s509_s14, 0  ;;  %p52_p3 = scmp.ne.s32.totalorder %s493_s10, %s489_s9 }
   0xa   : > { %s724_s17 = smov (%p28_p0, %s27_s17), 0  ;;  %p53_p5 = scmp.eq.s32.totalorder %s319_s15, 0 }
   0xb   : > { %p570_p4 = por %p47_p2, %p46_p1  ;;  %s35_s20 = ssub.s32 %s505_s13, %s724_s17 }
   0xc   : > { %p104_p6 = scmp.eq.s32.totalorder %s319_s15, 1  ;;  %p37_p7 = scmp.eq.s32.totalorder %s35_s20, 0 }
   0xd   : > { %p576_p8 = por %p53_p5, %p52_p3  ;;  %p110_p10 = scmp.eq.s32.totalorder %s320_s16, 1 }
   0xe   : > { %p580_p9 = por %p104_p6, %p46_p1  ;;  %p345_p13 = scmp.lt.s32.totalorder %s509_s14, 2 }
   0xf   : > { %s585_s23 = scalar_select %p37_p7, %s497_s11, %s39_s18  }
  0x10   : > { %s710_s22 = scalar_select %p580_p9, 1, 0 }
  0x11   : > { %p587_p11 = por %p110_p10, %p52_p3  ;;  %s137_s25 = sand.u32 1, %s497_s11  }
  0x12   : > { %s324_s26 = sshll.u32 %s137_s25, 3  ;;  %s325_s27 = sshll.u32 %s505_s13, 7 }
  0x13   : > { %s711_s24 = scalar_select %p587_p11, 1, 0 }
  0x14   : > { %s598_s30 = scalar_lea.hbm %s704_s0, %s325_s27  ;;  %s141_s3 = scalar_lea.vmem [#allocation2], %s324_s26 }
  0x15   : > { %s150_s4 = sshll.u32 %s141_s3, 4  ;;  %p604_p0 = pnand %p345_p13, %p570_p4  ;;  %s600_s4 = int_to_ptr.vmem [resolvable:$true] %s150_s4 }
  0x16   : > { %s138_s6 = scalar_lea.sflag [#allocation3], %s137_s25  ;;  %s397_s7 = scalar_lea.hbm %s598_s30, 128 }
  0x17   : > { %p398_p3 = scmp.ne.s32.totalorder %s598_s30, %s397_s7  ;;  %p399_p5 = pneg %p604_p0 }
  0x18   : > { %s402_s16 = scalar_lea.hbm %s704_s0, 256  ;;  %p403_p4 = scmp.lt.u32.totalorder %s598_s30, %s704_s0 }
  0x19   : > { %p400_p6 = pnand %p399_p5, %p398_p3  ;;  %p404_p10 = scmp.lt.u32.totalorder %s402_s16, %s397_s7 }
  0x1a   : > { %p406_p12 = scmp.lt.u32.totalorder %s397_s7, %s598_s30 }
  0x1b   : > { %p401_p7 = pneg %p400_p6  ;;  %p405_p13 = por %p404_p10, %p403_p4 }
  0x1d   : > { %p407_p1 = por %p406_p12, %p405_p13 }
  0x1f   : > { %p408_p2 = pnand %p407_p1, %p401_p7 }
  0x21   : > { %411 = shalt.err (!%p408_p2)
}
  0x22   : > { %s412_s20 = scalar_lea.vmem %s600_s4, 128  ;;  %s511_s25 = smov [#allocation2]  }
  0x23   : > { %p413_p3 = scmp.ne.s32.totalorder %s600_s4, %s412_s20  ;;  %s417_s26 = sshll.u32 %s511_s25, 4  ;;  %s418_s26 = int_to_ptr.vmem [resolvable:$false] %s417_s26 }
  0x24   : > { %s419_s27 = scalar_lea.vmem %s418_s26, 256  ;;  %p420_p9 = scmp.lt.s32.totalorder %s600_s4, %s418_s26 }
  0x25   : > { %p415_p6 = pnand %p413_p3, %p399_p5  ;;  %p421_p4 = scmp.lt.s32.totalorder %s419_s27, %s412_s20 }
  0x27   : > { %p416_p11 = pneg %p415_p6  ;;  %p422_p10 = por %p421_p4, %p420_p9 }
  0x29   : > { %p423_p12 = pnand %p422_p10, %p416_p11 }
  0x2b   : > { %426 = shalt.err (!%p423_p12)
}
  0x2c   : > { %340 = dma.hbm_to_vmem [thread:$0]  (!%p604_p0), %s598_s30, 128, %s600_s4, %s138_s6  }
  0x2d   : > { %p713_p1 = scmp.lt.s32.totalorder %s509_s14, 3  ;;  %p714_p2 = scmp.ge.s32.totalorder %s509_s14, 1 }
  0x2f   : > { %p156_p5 = pnand %p714_p2, %p713_p1 }
  0x30   : > { %s640_s28 = sand.u32 (!%p156_p5), 1, %s493_s10  }
  0x31   : > { %159 = sbr.rel (%p156_p5) target bundleno = 207 (0xcf), region = 28  ;;  %s327_s29 = sshll.u32 (!%p156_p5), %s640_s28, 3 }
  0x32   : > { %s162_s3 = scalar_lea.sflag (!%p156_p5), [#allocation3], %s640_s28  ;;  %s165_s7 = scalar_lea.vmem (!%p156_p5), [#allocation2], %s327_s29 }
  0x38   : > { %480 = dma.done.wait (%p576_p8), %s162_s3, 128  }
  0x39   : > { %482 = vsyncadd (%p576_p8), %s162_s3, 4294967168  ;;  %v512_v0 = vmov 0   ;;  %v195_v1 = vld [vmem:[%s705_s1] sm:$0xff]  ;;  %s330_s5 = sshll.u32 %s501_s12, 7  ;;  %s189_s6 = scalar_lea.vmem [#allocation5], %s327_s29 }
  0x3a   : > { %396 = vset.pattern.permute.xlu0 %v512_v0  ;;  %v194_v2 = vld [vmem:[%s165_s7] sm:$0xff]  ;;  %s222_s8 = sshll.u32 %s189_s6, 4  ;;  %s655_s16 = scalar_lea.hbm %s706_s2, %s330_s5  ;;  %s657_s8 = int_to_ptr.vmem [resolvable:$true] %s222_s8 }
  0x3b   : > { %198 = vperm.xlu0 %396, %v195_v1   ;;  %s207_s18 = scalar_lea.sflag [#allocation4], %s640_s28  ;;  %s427_s19 = scalar_lea.vmem %s657_s8, 128 }
  0x3c   : > { %p428_p8 = scmp.ne.s32.totalorder %s657_s8, %s427_s19  ;;  %p715_p9 = scmp.ne.s32.totalorder %s710_s22, 0 }
  0x3d   : > { %s513_s12 = smov [#allocation5]  }
  0x3e   : > { %p429_p11 = pnand %p428_p8, %p715_p9  ;;  %s431_s20 = sshll.u32 %s513_s12, 4  ;;  %s432_s20 = int_to_ptr.vmem [resolvable:$false] %s431_s20 }
  0x3f   : > { %s433_s25 = scalar_lea.vmem %s432_s20, 256  ;;  %p434_p7 = scmp.lt.s32.totalorder %s657_s8, %s432_s20 }
  0x40   : > { %p430_p0 = pneg %p429_p11  ;;  %p435_p13 = scmp.lt.s32.totalorder %s433_s25, %s427_s19 }
  0x42   : > { %p436_p3 = por %p435_p13, %p434_p7 }
  0x44   : > { %p437_p6 = pnand %p436_p3, %p430_p0 }
  0xba   : > { %v199_v3 = vpop.permute.xlu0 %198 }
  0xbb   : > { %v201_v4 = vadd.f32 %v199_v3, %v194_v2 }
  0xbd   : > { %v202_v5 = vmul.f32 1.4142135, %v201_v4  ;;  %v203_v6 = vmul.f32 0.28284273, %v201_v4 }
  0xbf   : > { %v204_v7 = vmax.f32 %v202_v5, %v203_v6 }
  0xc1   : > { %205 = vst [vmem:[%s189_s6] sm:$0xff] %v204_v7 }
  0xc2   : > { %440 = shalt.err (!%p437_p6)
}
  0xc3   : > { %s441_s26 = scalar_lea.hbm %s655_s16, 128  ;;  %s445_s29 = scalar_lea.hbm %s706_s2, 256 }
  0xc4   : > { %p442_p4 = scmp.ne.s32.totalorder %s655_s16, %s441_s26  ;;  %p446_p1 = scmp.lt.u32.totalorder %s655_s16, %s706_s2 }
  0xc5   : > { %p447_p2 = scmp.lt.u32.totalorder %s445_s29, %s441_s26  ;;  %p449_p8 = scmp.lt.u32.totalorder %s441_s26, %s655_s16 }
  0xc6   : > { %p443_p10 = pnand %p442_p4, %p715_p9 }
  0xc7   : > { %p448_p5 = por %p447_p2, %p446_p1 }
  0xc8   : > { %p444_p12 = pneg %p443_p10 }
  0xc9   : > { %p450_p11 = por %p449_p8, %p448_p5 }
  0xcb   : > { %p451_p0 = pnand %p450_p11, %p444_p12 }
  0xcd   : > { %454 = shalt.err (!%p451_p0)
}
  0xce   : > { %335 = dma.vmem_to_hbm [thread:$0]  (%p715_p9), %s657_s8, 128, %s655_s16, %s207_s18  }
  0xcf PF: > { %s234_s30 = sand.u32 1, %s489_s9   ;;  %p716_p7 = scmp.ne.s32.totalorder %s711_s24, 0 }
  0xd0   : > { %p717_p13 = scmp.ge.s32.totalorder %s509_s14, 2  ;;  %s235_s4 = scalar_lea.sflag [#allocation4], %s234_s30 }
  0xd2   : > { %p342_p3 = pnand %p717_p13, %p716_p7 }
  0xd4   : > { %484 = dma.done.wait (!%p342_p3), %s235_s4, 128  }
  0xd5   : > { %486 = vsyncadd (!%p342_p3), %s235_s4, 4294967168  ;;  %s18_s14 = sadd.s32 1, %s509_s14   ;;  %s718_s9 = smov %s493_s10 }
  0xd6   : > { %p15_p6 = scmp.ge.s32.totalorder %s18_s14, 4   ;;  %s719_s10 = smov %s497_s11 }
  0xd7   : > { %s720_s11 = smov %s585_s23  ;;  %s721_s12 = smov %s505_s13 }
  0xd8   : > { %s722_s13 = smov %s724_s17  ;;  %17 = sbr.rel (!%p15_p6) target bundleno = 6 (0x6), region = 76 }
  0xdf   :  { %240 = vsyncpa [#allocation3], 1 }
  0xe0   :  { %242 = vsyncpa [#allocation3 + $0x1], 1 }
  0xe1   :  { %243 = vsyncpa [#allocation4], 1 }
  0xe2   :  { %245 = vsyncpa [#allocation4 + $0x1], 1 }

</bundles_post_ra>
